<compile_context>
chip_gen: v7x
topology: tpu7x:2x2x1
jax: 0.10.0
libtpu: 0.0.40
codegen_flags: <defaults>
</compile_context>

<pallas_src>
import functools

import jax
import jax.numpy as jnp
from jax import lax
from jax.experimental import pallas as pl
from jax.experimental.pallas import tpu as pltpu


LANES = 128
SUBLANES = 8                     # f32 sublanes per vreg
CHUNK_ROWS = 256                 # rows per inner-loop chunk (32 f32 vregs)
TARGET_BLOCK_BYTES = 4 * 1024 * 1024   # ~4 MiB input block per grid step


def _ceil_div(a, b):
    return -(-a // b)


def _rainbow_kernel(x_ref, out_ref, max_acc, min_acc, sum_acc, *,
                    tile_rows, total_valid, needs_mask):
    i = pl.program_id(0)
    nsteps = pl.num_programs(0)

    @pl.when(i == 0)
    def _():
        max_acc[...] = jnp.full_like(max_acc, -jnp.inf)
        min_acc[...] = jnp.full_like(min_acc, jnp.inf)
        sum_acc[...] = jnp.zeros_like(sum_acc)

    # Trace-time constants.
    full_rows = total_valid // LANES
    rem_lanes = total_valid % LANES
    n_chunks = tile_rows // CHUNK_ROWS
    rem_rows = tile_rows % CHUNK_ROWS          # always a multiple of 8

    def chunk_stats(xb, grow0, masked):
        """Reduce one (cr,128) f32 chunk to (8,128) partial max/min/sum."""
        cr = xb.shape[0]
        if masked:
            row = lax.broadcasted_iota(jnp.int32, (cr, LANES), 0)
            col = lax.broadcasted_iota(jnp.int32, (cr, LANES), 1)
            grow = grow0 + row                                   # global row
            valid = (grow < full_rows) | ((grow == full_rows) & (col < rem_lanes))
            xb_mx = jnp.where(valid, xb, -jnp.inf)
            xb_mn = jnp.where(valid, xb, jnp.inf)
            xb_sm = jnp.where(valid, xb, 0.0)
        else:
            xb_mx = xb_mn = xb_sm = xb
        g = cr // SUBLANES
        return (jnp.max(xb_mx.reshape(g, SUBLANES, LANES), axis=0),
                jnp.min(xb_mn.reshape(g, SUBLANES, LANES), axis=0),
                jnp.sum(xb_sm.reshape(g, SUBLANES, LANES), axis=0))

    def merge(carry, stats):
        mx, mn, sm = carry
        cmx, cmn, csm = stats
        return (jnp.maximum(mx, cmx), jnp.minimum(mn, cmn), sm + csm)

    def accumulate_tile(masked):
        base_row = i * tile_rows
        carry = (max_acc[...], min_acc[...], sum_acc[...])
        if n_chunks > 0:
            def body(k, c):
                off = pl.multiple_of(k * CHUNK_ROWS, CHUNK_ROWS)
                xb = x_ref[pl.ds(off, CHUNK_ROWS), :].astype(jnp.float32)
                return merge(c, chunk_stats(xb, base_row + off, masked))
            if masked:
                unroll = False                      # cold path, runs once
            else:
                unroll = True if n_chunks <= 8 else 8
            carry = lax.fori_loop(0, n_chunks, body, carry, unroll=unroll)
        if rem_rows > 0:
            off = n_chunks * CHUNK_ROWS
            xb = x_ref[pl.ds(off, rem_rows), :].astype(jnp.float32)
            carry = merge(carry, chunk_stats(xb, base_row + off, masked))
        max_acc[...], min_acc[...], sum_acc[...] = carry

    if needs_mask:
        # Only the final grid step pays for the validity mask.
        @pl.when(i < nsteps - 1)
        def _():
            accumulate_tile(False)

        @pl.when(i == nsteps - 1)
        def _():
            accumulate_tile(True)
    else:
        accumulate_tile(False)

    @pl.when(i == nsteps - 1)
    def _():
        # Single cross-lane/sublane (XLU) reduction, once per call.
        mx = jnp.max(max_acc[...])
        mn = jnp.min(min_acc[...])
        mean = jnp.sum(sum_acc[...]) / jnp.float32(total_valid)
        lane = lax.broadcasted_iota(jnp.int32, (1, LANES), 1)
        out_ref[...] = jnp.where(
            lane == 0, mx,
            jnp.where(lane == 1, mn,
                      jnp.where(lane == 2, mean, jnp.float32(0.0))))


def _rainbow_pallas(x):
    """Returns a (1, 128) f32 array: lane0=max, lane1=min, lane2=mean."""
    total = int(x.size)
    assert total > 0, "deepprint: empty tensor"

    itemsize = jnp.dtype(x.dtype).itemsize
    pack = SUBLANES * max(1, 4 // itemsize)      # 8 (f32), 16 (bf16), 32 (i8)
    align = pack * LANES

    flat = jnp.ravel(x)
    padded_total = _ceil_div(total, align) * align
    if padded_total != total:
        # Only ragged sizes pay this single copy (see TODO at top of file).
        flat = jnp.pad(flat, (0, padded_total - total))
    rows = padded_total // LANES                 # always a multiple of `pack`
    x2d = flat.reshape(rows, LANES)

    max_tile_rows = TARGET_BLOCK_BYTES // (LANES * itemsize)
    max_tile_rows = max(pack, (max_tile_rows // CHUNK_ROWS) * CHUNK_ROWS)
    tile_rows = min(rows, max_tile_rows)
    grid_n = _ceil_div(rows, tile_rows)          # last block may over-cover
    needs_mask = (grid_n * tile_rows * LANES != total)

    kernel = functools.partial(
        _rainbow_kernel,
        tile_rows=tile_rows,
        total_valid=total,
        needs_mask=needs_mask,
    )

    return pl.pallas_call(
        kernel,
        out_shape=jax.ShapeDtypeStruct((1, LANES), jnp.float32),
        grid_spec=pltpu.PrefetchScalarGridSpec(
            num_scalar_prefetch=0,
            grid=(grid_n,),
            in_specs=[pl.BlockSpec((tile_rows, LANES), lambda i: (i, 0))],
            out_specs=pl.BlockSpec((1, LANES), lambda i: (0, 0)),
            scratch_shapes=[
                pltpu.VMEM((SUBLANES, LANES), jnp.float32),   # running max
                pltpu.VMEM((SUBLANES, LANES), jnp.float32),   # running min
                pltpu.VMEM((SUBLANES, LANES), jnp.float32),   # running sum
            ],
        ),
        compiler_params=pltpu.CompilerParams(
            dimension_semantics=("arbitrary",),   # reduction carried in scratch
            vmem_limit_bytes=32 * 1024 * 1024,
        ),
    )(x2d)


class DeepPrint:
    """JAX/Pallas port of the PyTorch `deepprint` debug module."""

    def __init__(self, name, func="rainbow", treshold=1000000, n_skip=1):
        self.name = name
        self.tres = treshold
        self.id = 0
        self.n_skip = n_skip
        if func == "rainbow":
            self.func = "rainbow"

    def __call__(self, x):
        self.id += 1

        # One small (1,128) device->host transfer per call; required because
        # the threshold / raise check happens on every invocation (matches the
        # reference module).  The input itself never makes an extra HBM trip.
        stats = jax.device_get(_rainbow_pallas(x))
        xmax_v = float(stats[0, 0])
        xmin_v = float(stats[0, 1])
        xmean_v = float(stats[0, 2])

        if xmean_v > self.tres or xmean_v < -self.tres:
            print(self.name, [xmax_v, xmean_v, xmin_v])
            raise MemoryError("(deepprint) Weight explosion caught!")
        elif self.id % self.n_skip == 0:
            print(self.name, [xmax_v, xmean_v, xmin_v])

        # forward returns x unchanged (identity).
        return x


if __name__ == "__main__":
    key = jax.random.PRNGKey(0)
    # conv-style NCHW input: batch=2, channels=4, spatial=16x16
    x = jax.random.normal(key, (2, 4, 16, 16), dtype=jnp.float32)

    dp = DeepPrint("demo_layer", func="rainbow", treshold=1000000, n_skip=1)
    y = dp(x)
    y = jax.block_until_ready(y)

    # forward is identity
    assert y.shape == x.shape and y.dtype == x.dtype
    assert bool(jnp.allclose(y, x))

    # kernel stats vs. plain-JAX reference (aligned size, single tile)
    stats = jax.block_until_ready(_rainbow_pallas(x))
    assert bool(jnp.allclose(stats[0, 0], jnp.max(x), rtol=1e-6))
    assert bool(jnp.allclose(stats[0, 1], jnp.min(x), rtol=1e-6))
    assert bool(jnp.allclose(stats[0, 2], jnp.mean(x), rtol=1e-5, atol=1e-6))

    # ragged shape -> exercises the padded-tail + masked final-step path
    x2 = jax.random.normal(jax.random.PRNGKey(1), (3, 5, 7), dtype=jnp.float32)
    stats2 = jax.block_until_ready(_rainbow_pallas(x2))
    assert bool(jnp.allclose(stats2[0, 0], jnp.max(x2), rtol=1e-6))
    assert bool(jnp.allclose(stats2[0, 1], jnp.min(x2), rtol=1e-6))
    assert bool(jnp.allclose(stats2[0, 2], jnp.mean(x2), rtol=1e-5, atol=1e-6))

    # multi-tile grid (grid > 1) with row over-coverage on the final step
    x3 = jax.random.normal(jax.random.PRNGKey(2), (8208, 128), dtype=jnp.float32)
    stats3 = jax.block_until_ready(_rainbow_pallas(x3))
    assert bool(jnp.allclose(stats3[0, 0], jnp.max(x3), rtol=1e-6))
    assert bool(jnp.allclose(stats3[0, 1], jnp.min(x3), rtol=1e-6))
    assert bool(jnp.allclose(stats3[0, 2], jnp.mean(x3), rtol=1e-4, atol=1e-5))

    # bf16 path (dtype-aware packing, per-chunk f32 cast)
    x4 = jax.random.normal(jax.random.PRNGKey(3), (4, 8, 32), dtype=jnp.bfloat16)
    stats4 = jax.block_until_ready(_rainbow_pallas(x4))
    assert bool(jnp.allclose(stats4[0, 0], jnp.max(x4).astype(jnp.float32)))
    assert bool(jnp.allclose(stats4[0, 1], jnp.min(x4).astype(jnp.float32)))
    assert bool(jnp.allclose(stats4[0, 2],
                             jnp.mean(x4.astype(jnp.float32)),
                             rtol=1e-5, atol=1e-5))

    print("KERNEL_OK")
</pallas_src>

<mosaic_0001>
module attributes {stable_mosaic.version = 11 : i64} {
  func.func @_rainbow_kernel(%arg0: i32, %arg1: memref<16x128xf32, #tpu.memory_space<vmem>>, %arg2: memref<1x128xf32, #tpu.memory_space<vmem>>, %arg3: memref<8x128xf32, #tpu.memory_space<vmem>>, %arg4: memref<8x128xf32, #tpu.memory_space<vmem>>, %arg5: memref<8x128xf32, #tpu.memory_space<vmem>>) attributes {dimension_semantics = [#tpu.dimension_semantics<arbitrary>], iteration_bounds = array<i64: 1>, scalar_prefetch = 0 : i64, scratch_operands = 3 : i64, tpu.core_type = #tpu.core_type<tc>, window_params = [{transform_indices = @transform_0, window_bounds = array<i64: 16, 128>}, {pipeline_mode = #tpu.pipeline_mode<synchronous>, transform_indices = @transform_1, window_bounds = array<i64: 1, 128>}]} {
    %c0_i32 = arith.constant 0 : i32
    %0 = arith.cmpi eq, %arg0, %c0_i32 : i32
    %1 = arith.extui %0 : i1 to i32
    %c0_i32_0 = arith.constant 0 : i32
    %2 = arith.cmpi ne, %1, %c0_i32_0 : i32
    scf.if %2 {
      %cst_18 = arith.constant 0xFF800000 : f32
      %22 = vector.broadcast %cst_18 : f32 to vector<8x128xf32>
      %c0_19 = arith.constant 0 : index
      %c0_20 = arith.constant 0 : index
      %23 = vector.load %arg3[%c0_19, %c0_20] : memref<8x128xf32, #tpu.memory_space<vmem>>, vector<8x128xf32>
      tpu.vector_store %arg3[%c0_19, %c0_20], %22 {strides = array<i32>} : memref<8x128xf32, #tpu.memory_space<vmem>>, vector<8x128xf32>,
      %cst_21 = arith.constant 0x7F800000 : f32
      %24 = vector.broadcast %cst_21 : f32 to vector<8x128xf32>
      %c0_22 = arith.constant 0 : index
      %c0_23 = arith.constant 0 : index
      %25 = vector.load %arg4[%c0_22, %c0_23] : memref<8x128xf32, #tpu.memory_space<vmem>>, vector<8x128xf32>
      tpu.vector_store %arg4[%c0_22, %c0_23], %24 {strides = array<i32>} : memref<8x128xf32, #tpu.memory_space<vmem>>, vector<8x128xf32>,
      %cst_24 = arith.constant 0.000000e+00 : f32
      %26 = vector.broadcast %cst_24 : f32 to vector<8x128xf32>
      %c0_25 = arith.constant 0 : index
      %c0_26 = arith.constant 0 : index
      %27 = vector.load %arg5[%c0_25, %c0_26] : memref<8x128xf32, #tpu.memory_space<vmem>>, vector<8x128xf32>
      tpu.vector_store %arg5[%c0_25, %c0_26], %26 {strides = array<i32>} : memref<8x128xf32, #tpu.memory_space<vmem>>, vector<8x128xf32>,
    } else {
    }
    %c0 = arith.constant 0 : index
    %c0_1 = arith.constant 0 : index
    %3 = vector.load %arg3[%c0, %c0_1] : memref<8x128xf32, #tpu.memory_space<vmem>>, vector<8x128xf32>
    %c0_2 = arith.constant 0 : index
    %c0_3 = arith.constant 0 : index
    %4 = vector.load %arg4[%c0_2, %c0_3] : memref<8x128xf32, #tpu.memory_space<vmem>>, vector<8x128xf32>
    %c0_4 = arith.constant 0 : index
    %c0_5 = arith.constant 0 : index
    %5 = vector.load %arg5[%c0_4, %c0_5] : memref<8x128xf32, #tpu.memory_space<vmem>>, vector<8x128xf32>
    %c0_6 = arith.constant 0 : index
    %c0_7 = arith.constant 0 : index
    %6 = vector.load %arg1[%c0_6, %c0_7] : memref<16x128xf32, #tpu.memory_space<vmem>>, vector<16x128xf32>
    %7 = vector.shape_cast %6 : vector<16x128xf32> to vector<2x8x128xf32>
    %cst = arith.constant dense<0xFF800000> : vector<8x128xf32>
    %8 = vector.multi_reduction <maximumf>, %7, %cst [0] : vector<2x8x128xf32> to vector<8x128xf32>
    %9 = vector.shape_cast %6 : vector<16x128xf32> to vector<2x8x128xf32>
    %cst_8 = arith.constant dense<0x7F800000> : vector<8x128xf32>
    %10 = vector.multi_reduction <minimumf>, %9, %cst_8 [0] : vector<2x8x128xf32> to vector<8x128xf32>
    %11 = vector.shape_cast %6 : vector<16x128xf32> to vector<2x8x128xf32>
    %cst_9 = arith.constant dense<0.000000e+00> : vector<8x128xf32>
    %12 = vector.multi_reduction <add>, %11, %cst_9 [0] : vector<2x8x128xf32> to vector<8x128xf32>
    %13 = arith.maximumf %3, %8 : vector<8x128xf32>
    %14 = arith.minimumf %4, %10 : vector<8x128xf32>
    %15 = arith.addf %5, %12 : vector<8x128xf32>
    %c0_10 = arith.constant 0 : index
    %c0_11 = arith.constant 0 : index
    %16 = vector.load %arg3[%c0_10, %c0_11] : memref<8x128xf32, #tpu.memory_space<vmem>>, vector<8x128xf32>
    tpu.vector_store %arg3[%c0_10, %c0_11], %13 {strides = array<i32>} : memref<8x128xf32, #tpu.memory_space<vmem>>, vector<8x128xf32>,
    %c0_12 = arith.constant 0 : index
    %c0_13 = arith.constant 0 : index
    %17 = vector.load %arg4[%c0_12, %c0_13] : memref<8x128xf32, #tpu.memory_space<vmem>>, vector<8x128xf32>
    tpu.vector_store %arg4[%c0_12, %c0_13], %14 {strides = array<i32>} : memref<8x128xf32, #tpu.memory_space<vmem>>, vector<8x128xf32>,
    %c0_14 = arith.constant 0 : index
    %c0_15 = arith.constant 0 : index
    %18 = vector.load %arg5[%c0_14, %c0_15] : memref<8x128xf32, #tpu.memory_space<vmem>>, vector<8x128xf32>
    tpu.vector_store %arg5[%c0_14, %c0_15], %15 {strides = array<i32>} : memref<8x128xf32, #tpu.memory_space<vmem>>, vector<8x128xf32>,
    %c0_i32_16 = arith.constant 0 : i32
    %19 = arith.cmpi eq, %arg0, %c0_i32_16 : i32
    %20 = arith.extui %19 : i1 to i32
    %c0_i32_17 = arith.constant 0 : i32
    %21 = arith.cmpi ne, %20, %c0_i32_17 : i32
    scf.if %21 {
      %c0_18 = arith.constant 0 : index
      %c0_19 = arith.constant 0 : index
      %22 = vector.load %arg3[%c0_18, %c0_19] : memref<8x128xf32, #tpu.memory_space<vmem>>, vector<8x128xf32>
      %23 = vector.shape_cast %22 : vector<8x128xf32> to vector<1x8x128xf32>
      %cst_20 = arith.constant dense<0xFF800000> : vector<1xf32>
      %24 = vector.multi_reduction <maximumf>, %23, %cst_20 [1, 2] : vector<1x8x128xf32> to vector<1xf32>
      %25 = vector.shape_cast %24 : vector<1xf32> to vector<1x1x1xf32>
      %26 = vector.extract %25[0, 0, 0] : f32 from vector<1x1x1xf32>
      %c0_21 = arith.constant 0 : index
      %c0_22 = arith.constant 0 : index
      %27 = vector.load %arg4[%c0_21, %c0_22] : memref<8x128xf32, #tpu.memory_space<vmem>>, vector<8x128xf32>
      %28 = vector.shape_cast %27 : vector<8x128xf32> to vector<1x8x128xf32>
      %cst_23 = arith.constant dense<0x7F800000> : vector<1xf32>
      %29 = vector.multi_reduction <minimumf>, %28, %cst_23 [1, 2] : vector<1x8x128xf32> to vector<1xf32>
      %30 = vector.shape_cast %29 : vector<1xf32> to vector<1x1x1xf32>
      %31 = vector.extract %30[0, 0, 0] : f32 from vector<1x1x1xf32>
      %c0_24 = arith.constant 0 : index
      %c0_25 = arith.constant 0 : index
      %32 = vector.load %arg5[%c0_24, %c0_25] : memref<8x128xf32, #tpu.memory_space<vmem>>, vector<8x128xf32>
      %33 = vector.shape_cast %32 : vector<8x128xf32> to vector<1x8x128xf32>
      %cst_26 = arith.constant dense<0.000000e+00> : vector<1xf32>
      %34 = vector.multi_reduction <add>, %33, %cst_26 [1, 2] : vector<1x8x128xf32> to vector<1xf32>
      %35 = vector.shape_cast %34 : vector<1xf32> to vector<1x1x1xf32>
      %36 = vector.extract %35[0, 0, 0] : f32 from vector<1x1x1xf32>
      %cst_27 = arith.constant 2.048000e+03 : f32
      %37 = arith.divf %36, %cst_27 : f32
      %38 = tpu.iota {dimensions = array<i32: 1>} : vector<1x128xi32>
      %c0_i32_28 = arith.constant 0 : i32
      %39 = vector.broadcast %c0_i32_28 : i32 to vector<1x128xi32>
      %40 = arith.cmpi eq, %38, %39 : vector<1x128xi32>
      %c1_i32 = arith.constant 1 : i32
      %41 = vector.broadcast %c1_i32 : i32 to vector<1x128xi32>
      %42 = arith.cmpi eq, %38, %41 : vector<1x128xi32>
      %c2_i32 = arith.constant 2 : i32
      %43 = vector.broadcast %c2_i32 : i32 to vector<1x128xi32>
      %44 = arith.cmpi eq, %38, %43 : vector<1x128xi32>
      %cst_29 = arith.constant 0.000000e+00 : f32
      %45 = vector.broadcast %37 : f32 to vector<1x128xf32>
      %46 = vector.broadcast %cst_29 : f32 to vector<1x128xf32>
      %47 = arith.select %44, %45, %46 : vector<1x128xi1>, vector<1x128xf32>
      %48 = vector.broadcast %31 : f32 to vector<1x128xf32>
      %49 = arith.select %42, %48, %47 : vector<1x128xi1>, vector<1x128xf32>
      %50 = vector.broadcast %26 : f32 to vector<1x128xf32>
      %51 = arith.select %40, %50, %49 : vector<1x128xi1>, vector<1x128xf32>
      %c0_30 = arith.constant 0 : index
      %c0_31 = arith.constant 0 : index
      %52 = vector.load %arg2[%c0_30, %c0_31] : memref<1x128xf32, #tpu.memory_space<vmem>>, vector<1x128xf32>
      tpu.vector_store %arg2[%c0_30, %c0_31], %51 {strides = array<i32>} : memref<1x128xf32, #tpu.memory_space<vmem>>, vector<1x128xf32>,
    } else {
    }
    return
  }
  func.func @transform_0(%arg0: i32) -> (i32, i32) {
    %c0_i32 = arith.constant 0 : i32
    %c0_i32_0 = arith.constant 0 : i32
    return %arg0, %c0_i32 : i32, i32
  }
  func.func @transform_1(%arg0: i32) -> (i32, i32) {
    %c0_i32 = arith.constant 0 : i32
    %c0_i32_0 = arith.constant 0 : i32
    %c0_i32_1 = arith.constant 0 : i32
    return %c0_i32, %c0_i32_0 : i32, i32
  }
}

</mosaic_0001>

<bundles_post_ra>
// kernel: tpu_custom_call.1
= control target key start
LH: loop header
LB: loop body
LE: loop exit
PB: predicated region body
PF: predicated region fallthrough
CT: control target
= control target key end

     0   :  { %6 = vsyncpa [#allocation6], 0  ;;  %s203_s0 = inlined_call_operand.hbm [shape: f32[16,128], index: 0, kind: input, shape index: {}]   ;;  %s204_s1 = inlined_call_operand.hbm [shape: f32[1,128], index: 1, kind: output, shape index: {}]  }
   0x1   :  { %7 = vsyncpa [#allocation7], 0  ;;  %s165_s6 = smov [#allocation5]   ;;  %s117_s10 = scalar_lea.hbm %s203_s0, 256 }
   0x2   :  { %s13_s7 = sshll.u32 %s165_s6, 4  ;;  %p118_p0 = scmp.ne.s32.totalorder %s203_s0, %s117_s10  ;;  %s14_s7 = int_to_ptr.vmem [resolvable:$true] %s13_s7 }
   0x3   :  { %p121_p1 = scmp.lt.u32.totalorder %s117_s10, %s203_s0 }
   0x5   :  { %p123_p2 = pnand %p121_p1, %p118_p0 }
   0x7   :  { %126 = shalt.err (!%p123_p2)
}
   0x8   :  { %s127_s15 = scalar_lea.vmem %s14_s7, 256  ;;  %p132_p4 = scmp.lt.s32.totalorder %s14_s7, %s14_s7 }
   0x9   :  { %p128_p3 = scmp.ne.s32.totalorder %s14_s7, %s127_s15  ;;  %p133_p5 = scmp.lt.s32.totalorder %s127_s15, %s127_s15 }
   0xb   :  { %p134_p6 = por %p133_p5, %p132_p4 }
   0xd   :  { %p135_p7 = pnand %p134_p6, %p128_p3 }
   0xf   :  { %138 = shalt.err (!%p135_p7)
}
  0x10   :  { %s166_s16 = smov 128   ;;  %s167_s17 = smov 8  }
  0x11   :  { %19 = dma.hbm_to_vmem [thread:$0]  %s203_s0, 256, %s14_s7, [#allocation6], %s166_s16, %s166_s16, %s167_s17  }
  0x12   :  { %161 = dma.done.wait [#allocation6], 256  }
  0x13   :  { %162 = vsyncadd [#allocation6], 4294967040  ;;  %v33_v0 = vld [vmem:[#allocation5] sm:$0xff]  ;;  %v34_v1 = vld [vmem:[#allocation5 + $0x8] sm:$0xff]  ;;  %v80_v26 = vlaneseq  ;;  %s168_s23 = smov [#allocation8]  }
  0x14   :  { %v37_v2 = vadd.f32 %v34_v1, %v33_v0  ;;  %v35_v3 = vmax.f32 %v33_v0, %v34_v1  ;;  %v36_v4 = vmin.f32 %v33_v0, %v34_v1  ;;  %s98_s24 = sshll.u32 %s168_s23, 4  ;;  %s99_s24 = int_to_ptr.vmem [resolvable:$true] %s98_s24 }
  0x15   :  { %v81_v27 = vand.u32 127, %v80_v26  ;;  %s139_s25 = scalar_lea.vmem %s99_s24, 16  ;;  %s143_s26 = scalar_lea.vmem %s99_s24, 32 }
  0x16   :  { %68 = vadd.xlane.f32.xlu1 %v37_v2  ;;  %48 = vmax.xlane.f32.xlu0 %v35_v3  ;;  %p140_p8 = scmp.ne.s32.totalorder %s99_s24, %s139_s25  ;;  %p144_p9 = scmp.lt.s32.totalorder %s99_s24, %s99_s24 }
  0x17   :  { %vm84_vm0 = vcmp.eq.s32.totalorder %v81_v27, 2  ;;  %vm83_vm1 = vcmp.eq.s32.totalorder %v81_v27, 1  ;;  %vm82_vm2 = vcmp.eq.s32.totalorder %v81_v27, 0  ;;  %p145_p10 = scmp.lt.s32.totalorder %s143_s26, %s139_s25 }
  0x19   :  { %p146_p11 = por %p145_p10, %p144_p9 }
  0x1a   :  { %58 = vmin.xlane.f32.xlu0 %v36_v4 }
  0x1b   :  { %p147_p12 = pnand %p146_p11, %p140_p8 }
  0xa3   :  { %v69_v5 = vpop.xlane.xlu1 %68  ;;  %v49_v6 = vpop.xlane.xlu0 %48 }
  0xa4   :  { %v70_v7 = vrot.slane %v69_v5, 4  ;;  %v50_v8 = vrot.slane %v49_v6, 4 }
  0xa6   :  { %v71_v9 = vadd.f32 %v70_v7, %v69_v5  ;;  %v51_v10 = vmax.f32 %v49_v6, %v50_v8 }
  0xa7   :  { %v59_v11 = vpop.xlane.xlu0 %58 }
  0xa8   :  { %v72_v12 = vrot.slane %v71_v9, 2  ;;  %v52_v13 = vrot.slane %v51_v10, 2  ;;  %v60_v14 = vrot.slane %v59_v11, 4 }
  0xaa   :  { %v61_v15 = vmin.f32 %v59_v11, %v60_v14  ;;  %v53_v16 = vmax.f32 %v51_v10, %v52_v13  ;;  %v73_v17 = vadd.f32 %v72_v12, %v71_v9 }
  0xac   :  { %v62_v18 = vrot.slane %v61_v15, 2  ;;  %v54_v19 = vrot.slane %v53_v16, 1  ;;  %v74_v22 = vrot.slane %v73_v17, 1 }
  0xae   :  { %v63_v20 = vmin.f32 %v61_v15, %v62_v18  ;;  %v55_v21 = vmax.f32 %v53_v16, %v54_v19  ;;  %v75_v25 = vadd.f32 %v74_v22, %v73_v17 }
  0xb0   :  { %107 = vpush %v55_v21  ;;  %v64_v23 = vrot.slane %v63_v20, 1 }
  0xb2   :  { %v65_v24 = vmin.f32 %v63_v20, %v64_v23 }
  0xb4   :  { %109 = vpush %v65_v24 }
  0xb5   :  { %111 = vpush %v75_v25 }
  0xe1   :  { %s108_s0 = spop %107 }
  0xe2   :  { %v89_v31 = vstv %s108_s0 }
  0xe5   :  { %s110_s20 = spop %109 }
  0xe6   :  { %s112_s21 = spop %111  ;;  %v87_v29 = vstv %s110_s20 }
  0xe7   :  { %s79_s22 = smul.f32 0.00048828125, %s112_s21 }
  0xe9   :  { %v85_v28 = vstv %s79_s22 }
  0xea   :  { %v86_v30 = vsel %vm84_vm0, %v85_v28, 0.0 }
  0xeb   :  { %v88_v32 = vsel %vm83_vm1, %v87_v29, %v86_v30 }
  0xec   :  { %v90_v33 = vsel %vm82_vm2, %v89_v31, %v88_v32 }
  0xed   :  { %91 = vst [vmem:[#allocation8] sm:$0x1] %v90_v33 }
  0xee   :  { %150 = shalt.err (!%p147_p12)
}
  0xef   :  { %s151_s29 = scalar_lea.hbm %s204_s1, 16 }
  0xf0   :  { %p152_p13 = scmp.ne.s32.totalorder %s204_s1, %s151_s29  ;;  %p155_p0 = scmp.lt.u32.totalorder %s151_s29, %s204_s1 }
  0xf2   :  { %p157_p1 = pnand %p155_p0, %p152_p13 }
  0xf4   :  { %160 = shalt.err (!%p157_p1)
}
  0xf5   :  { %101 = dma.vmem_to_hbm [thread:$0]  %s99_s24, 16, %s204_s1, [#allocation7]  }
  0xf6   :  { %163 = dma.done.wait [#allocation7], 16  }
  0xf7   :  { %164 = vsyncadd [#allocation7], 4294967280 }
  0xf8   :  { %105 = vsyncpa [#allocation6], 1 }
  0xf9   :  { %106 = vsyncpa [#allocation7], 1 }

</bundles_post_ra>
